<compile_context>
chip_gen: v5e
topology: v5e:2x2
jax: 0.10.0
libtpu: 0.0.40
codegen_flags: <defaults>
</compile_context>

<pallas_src>
import functools

import jax
import jax.numpy as jnp
from jax.experimental import pallas as pl
from jax.experimental.pallas import tpu as pltpu

NEG_SLOPE = 0.01     # F.leaky_relu default negative_slope
NORM_EPS = 1e-12     # F.normalize default eps (reference only)
MAX_TILE_B = 2048    # batch tile cap (multiple of 8); per-step VMEM stays small


def _leaky_relu(x):
    return jnp.where(x > 0, x, NEG_SLOPE * x)


def _round_up(n, m):
    return ((n + m - 1) // m) * m


# ----------------------------------------------------------------------------
# Kernel
# ----------------------------------------------------------------------------
def spn_half_kernel(x_ref, w1_ref, b1_ref, w2_ref, b2_ref,
                    w34_ref, b34_ref, out_ref):
    cdt = w1_ref.dtype  # compute dtype for MXU inputs (f32 or bf16)

    # fc1 + leaky_relu.  x arrives in its HBM dtype; cast in-kernel (VPU op
    # hidden under DMA/MXU) instead of a separate wrapper-side XLA pass.
    h = jnp.dot(x_ref[...].astype(cdt), w1_ref[...],
                preferred_element_type=jnp.float32) + b1_ref[...]
    h = _leaky_relu(h)

    # fc2 (columns pre-permuted to [even | odd]) + leaky_relu.
    h = jnp.dot(h.astype(cdt), w2_ref[...],
                preferred_element_type=jnp.float32) + b2_ref[...]
    h = _leaky_relu(h)

    # Fused olayer1/olayer2: one block-diagonal matmul -> (tile_b, 2*dims).
    d = jnp.dot(h.astype(cdt), w34_ref[...],
                preferred_element_type=jnp.float32) + b34_ref[...]

    # atan2(d1, d2); F.normalize is redundant (atan2 is scale-invariant).
    dims = out_ref.shape[-1]
    out_ref[...] = jnp.arctan2(d[:, :dims], d[:, dims:]).astype(out_ref.dtype)


# ----------------------------------------------------------------------------
# One-time parameter preparation (hoisted out of the per-call path)
# ----------------------------------------------------------------------------
def prepare_params(params, compute_dtype=jnp.float32):
    """Transpose to (in, out), fold the even/odd channel split into fc2's
    columns, and fuse olayer1/olayer2 into one block-diagonal weight."""
    w1, b1, w2, b2, w3, b3, w4, b4 = params
    h_size = w2.shape[0]
    h_half = h_size // 2
    dims = w3.shape[0]

    # Even channels first, odd channels second (commutes with leaky_relu).
    perm = jnp.concatenate([jnp.arange(0, h_size, 2), jnp.arange(1, h_size, 2)])

    w1t = w1.T.astype(compute_dtype)                       # (F, H)
    b1r = b1[None, :].astype(jnp.float32)                  # (1, H)
    w2t = w2.T[:, perm].astype(compute_dtype)              # (H, H) permuted cols
    b2r = b2[perm][None, :].astype(jnp.float32)            # (1, H)

    # Block-diagonal fused output weight: rows 0:h_half feed d1 (cols 0:dims),
    # rows h_half:h feed d2 (cols dims:2*dims).  No lane padding: the output
    # block's last dim equals the full array dim, which is legal and avoids
    # 8x-padded HBM writes.
    w34 = jnp.zeros((h_size, 2 * dims), jnp.float32)
    w34 = w34.at[:h_half, :dims].set(w3.T)
    w34 = w34.at[h_half:, dims:].set(w4.T)
    w34 = w34.astype(compute_dtype)
    b34 = jnp.concatenate([b3, b4])[None, :].astype(jnp.float32)   # (1, 2*dims)

    return (w1t, b1r, w2t, b2r, w34, b34)


# ----------------------------------------------------------------------------
# Forward wrapper
# ----------------------------------------------------------------------------
@functools.partial(jax.jit, static_argnames=("out_dtype",))
def spn_half_forward(x, prepared, *, out_dtype=jnp.float32):
    w1t, b1r, w2t, b2r, w34, b34 = prepared
    batch, num_features = x.shape
    h_size = w1t.shape[1]
    two_d = w34.shape[1]
    dims = two_d // 2

    # Batch tile: full batch when tiny; otherwise aim for >= 4 grid steps
    # (so a 2-TensorCore part has work to shard) capped at MAX_TILE_B.
    if batch <= 8:
        tile_b = batch
    else:
        tile_b = min(MAX_TILE_B, max(8, _round_up(pl.cdiv(batch, 4), 8)))
    grid = (pl.cdiv(batch, tile_b),)

    xmap = lambda i: (i, 0)      # batch-tiled arrays
    const = lambda i: (0, 0)     # weights: constant block -> VMEM-resident

    # Scoped-VMEM budget from the actual per-step footprint (double-buffered
    # x/out tiles + weights + f32 activation scratch + headroom), clamped to a
    # range that is safe on v5e (16 MiB default / 128 MiB phys) through v7x
    # (32 MiB default / 64 MiB phys).
    weights_bytes = sum(int(a.size) * a.dtype.itemsize for a in prepared)
    x_tile_bytes = tile_b * num_features * x.dtype.itemsize
    out_tile_bytes = tile_b * dims * jnp.dtype(out_dtype).itemsize
    act_bytes = 4 * tile_b * max(h_size, two_d) * 4
    vmem_est = 2 * (x_tile_bytes + out_tile_bytes) + 2 * weights_bytes \
        + act_bytes + (2 << 20)
    vmem_limit = int(min(max(vmem_est, 32 << 20), 64 << 20))

    # NOTE (v7x, large h_size): once 2x(w1+w2+w34) plus activation tiles
    # approaches ~24-28 MiB, single-buffer the constant-index weight specs
    # (pipeline_mode=pl.Buffered(1)) and/or add a K-tiled grid axis over H.
    # NOTE (v7x): plain "parallel" is a hint; for guaranteed 2-core sharding
    # switch the batch axis to pltpu.CORE_PARALLEL on that target.
    return pl.pallas_call(
        spn_half_kernel,
        out_shape=jax.ShapeDtypeStruct((batch, dims), out_dtype),
        grid=grid,
        in_specs=[
            pl.BlockSpec((tile_b, num_features), xmap),
            pl.BlockSpec((num_features, h_size), const),
            pl.BlockSpec((1, h_size), const),
            pl.BlockSpec((h_size, h_size), const),
            pl.BlockSpec((1, h_size), const),
            pl.BlockSpec((h_size, two_d), const),
            pl.BlockSpec((1, two_d), const),
        ],
        out_specs=pl.BlockSpec((tile_b, dims), xmap),
        compiler_params=pltpu.CompilerParams(
            dimension_semantics=("parallel",),
            vmem_limit_bytes=vmem_limit),
    )(x, w1t, b1r, w2t, b2r, w34, b34)


# ----------------------------------------------------------------------------
# Pure-JAX reference (mirrors the PyTorch forward exactly, incl. normalize)
# ----------------------------------------------------------------------------
def reference_forward(x, params):
    w1, b1, w2, b2, w3, b3, w4, b4 = params
    h = _leaky_relu(x @ w1.T + b1)
    h = _leaky_relu(h @ w2.T + b2)
    hr = h.reshape(-1, h.shape[1] // 2, 2)
    d1 = hr[:, :, 0] @ w3.T + b3
    d2 = hr[:, :, 1] @ w4.T + b4
    stacked = jnp.stack([d1, d2], axis=2)
    norm = jnp.maximum(
        jnp.sqrt(jnp.sum(stacked * stacked, axis=2, keepdims=True)), NORM_EPS)
    nrm = stacked / norm
    return jnp.arctan2(nrm[:, :, 0], nrm[:, :, 1])


def _init_linear(key, out_f, in_f):
    # Deterministic nn.Linear-style init: U(-1/sqrt(fan_in), 1/sqrt(fan_in)).
    kw, kb = jax.random.split(key)
    bound = 1.0 / (in_f ** 0.5)
    w = jax.random.uniform(kw, (out_f, in_f), jnp.float32, -bound, bound)
    b = jax.random.uniform(kb, (out_f,), jnp.float32, -bound, bound)
    return w, b


def _max_angle_err(a, b):
    # Compare angles modulo 2*pi (atan2 branch-cut safe).
    d = a.astype(jnp.float32) - b.astype(jnp.float32)
    return jnp.max(jnp.abs(jnp.arctan2(jnp.sin(d), jnp.cos(d))))


if __name__ == "__main__":
    # Small shapes consistent with the module (MUL_FACTOR = 1).
    num_features = 32
    h_size = 32            # fc_layer_size
    h_half = h_size // 2   # fc_layer_size_half
    dims = 16

    root = jax.random.PRNGKey(0)
    kx, kx2, k1, k2, k3, k4 = jax.random.split(root, 6)

    w1, b1 = _init_linear(k1, h_size, num_features)   # fc1
    w2, b2 = _init_linear(k2, h_size, h_size)         # fc2
    w3, b3 = _init_linear(k3, dims, h_half)           # olayer1
    w4, b4 = _init_linear(k4, dims, h_half)           # olayer2
    params = (w1, b1, w2, b2, w3, b3, w4, b4)
    # NOTE: self.p / self.n (circular vectors) are not used by forward().

    # --- single-grid-step case -----------------------------------------
    batch = 8
    x = jax.random.normal(kx, (batch, num_features), jnp.float32)
    ref = jax.block_until_ready(reference_forward(x, params))

    prep_f32 = prepare_params(params, jnp.float32)
    out_f32 = jax.block_until_ready(spn_half_forward(x, prep_f32))
    assert out_f32.shape == (batch, dims), out_f32.shape
    err32 = float(_max_angle_err(out_f32, ref))
    assert err32 < 1e-3, f"f32 angular err {err32}"

    # bf16 MXU-input / f32-accumulate path (v6e/v7x-preferred).  atan2 is
    # ill-conditioned when |(d1,d2)| is small, so bf16 inputs can produce
    # ~1e-1 rad worst-case angle error even though typical error is ~1e-2;
    # this is a sanity bound, not an exactness check.
    prep_bf16 = prepare_params(params, jnp.bfloat16)
    out_bf16 = jax.block_until_ready(spn_half_forward(x, prep_bf16))
    assert out_bf16.shape == (batch, dims), out_bf16.shape
    assert bool(jnp.all(jnp.isfinite(out_bf16)))
    err16 = float(_max_angle_err(out_bf16, ref))
    assert err16 < 5e-1, f"bf16 angular err {err16}"

    # --- multi-grid-step / ragged-batch case ----------------------------
    batch2 = 100   # tile_b=32 -> 4 grid steps, last one partially masked
    x2 = jax.random.normal(kx2, (batch2, num_features), jnp.float32)
    ref2 = jax.block_until_ready(reference_forward(x2, params))
    out2 = jax.block_until_ready(spn_half_forward(x2, prep_f32))
    assert out2.shape == (batch2, dims), out2.shape
    err2 = float(_max_angle_err(out2, ref2))
    assert err2 < 1e-3, f"f32 (ragged batch) angular err {err2}"

    print("KERNEL_OK")
</pallas_src>

<mosaic_0001>
module attributes {stable_mosaic.version = 11 : i64} {
  func.func @spn_half_kernel(%arg0: i32, %arg1: memref<8x32xf32, #tpu.memory_space<vmem>>, %arg2: memref<32x32xf32, #tpu.memory_space<vmem>>, %arg3: memref<1x32xf32, #tpu.memory_space<vmem>>, %arg4: memref<32x32xf32, #tpu.memory_space<vmem>>, %arg5: memref<1x32xf32, #tpu.memory_space<vmem>>, %arg6: memref<32x32xf32, #tpu.memory_space<vmem>>, %arg7: memref<1x32xf32, #tpu.memory_space<vmem>>, %arg8: memref<8x16xf32, #tpu.memory_space<vmem>>) attributes {dimension_semantics = [#tpu.dimension_semantics<parallel>], iteration_bounds = array<i64: 1>, scalar_prefetch = 0 : i64, scratch_operands = 0 : i64, tpu.core_type = #tpu.core_type<tc>, window_params = [{transform_indices = @transform_0, window_bounds = array<i64: 8, 32>}, {pipeline_mode = #tpu.pipeline_mode<synchronous>, transform_indices = @transform_1, window_bounds = array<i64: 32, 32>}, {pipeline_mode = #tpu.pipeline_mode<synchronous>, transform_indices = @transform_2, window_bounds = array<i64: 1, 32>}, {pipeline_mode = #tpu.pipeline_mode<synchronous>, transform_indices = @transform_3, window_bounds = array<i64: 32, 32>}, {pipeline_mode = #tpu.pipeline_mode<synchronous>, transform_indices = @transform_4, window_bounds = array<i64: 1, 32>}, {pipeline_mode = #tpu.pipeline_mode<synchronous>, transform_indices = @transform_5, window_bounds = array<i64: 32, 32>}, {pipeline_mode = #tpu.pipeline_mode<synchronous>, transform_indices = @transform_6, window_bounds = array<i64: 1, 32>}, {transform_indices = @transform_7, window_bounds = array<i64: 8, 16>}]} {
    %c0 = arith.constant 0 : index
    %c0_0 = arith.constant 0 : index
    %0 = vector.load %arg1[%c0, %c0_0] : memref<8x32xf32, #tpu.memory_space<vmem>>, vector<8x32xf32>
    %c0_1 = arith.constant 0 : index
    %c0_2 = arith.constant 0 : index
    %1 = vector.load %arg2[%c0_1, %c0_2] : memref<32x32xf32, #tpu.memory_space<vmem>>, vector<32x32xf32>
    %cst = arith.constant dense<0.000000e+00> : vector<8x32xf32>
    %2 = tpu.matmul %0, %1, %cst {dimension_numbers = #tpu.dot_dimension_numbers<[1], [0], [0], [1], [0, 0, 1, 1], [], []>} : vector<8x32xf32>, vector<32x32xf32>, vector<8x32xf32> -> vector<8x32xf32>
    %c0_3 = arith.constant 0 : index
    %c0_4 = arith.constant 0 : index
    %3 = vector.load %arg3[%c0_3, %c0_4] : memref<1x32xf32, #tpu.memory_space<vmem>>, vector<1x32xf32>
    %4 = vector.broadcast %3 : vector<1x32xf32> to vector<8x32xf32>
    %5 = arith.addf %2, %4 : vector<8x32xf32>
    %cst_5 = arith.constant 0.000000e+00 : f32
    %6 = vector.broadcast %cst_5 : f32 to vector<8x32xf32>
    %7 = arith.cmpf ogt, %5, %6 : vector<8x32xf32>
    %cst_6 = arith.constant 0.00999999977 : f32
    %8 = vector.broadcast %cst_6 : f32 to vector<8x32xf32>
    %9 = arith.mulf %8, %5 : vector<8x32xf32>
    %10 = arith.select %7, %5, %9 : vector<8x32xi1>, vector<8x32xf32>
    %c0_7 = arith.constant 0 : index
    %c0_8 = arith.constant 0 : index
    %11 = vector.load %arg4[%c0_7, %c0_8] : memref<32x32xf32, #tpu.memory_space<vmem>>, vector<32x32xf32>
    %cst_9 = arith.constant dense<0.000000e+00> : vector<8x32xf32>
    %12 = tpu.matmul %10, %11, %cst_9 {dimension_numbers = #tpu.dot_dimension_numbers<[1], [0], [0], [1], [0, 0, 1, 1], [], []>} : vector<8x32xf32>, vector<32x32xf32>, vector<8x32xf32> -> vector<8x32xf32>
    %c0_10 = arith.constant 0 : index
    %c0_11 = arith.constant 0 : index
    %13 = vector.load %arg5[%c0_10, %c0_11] : memref<1x32xf32, #tpu.memory_space<vmem>>, vector<1x32xf32>
    %14 = vector.broadcast %13 : vector<1x32xf32> to vector<8x32xf32>
    %15 = arith.addf %12, %14 : vector<8x32xf32>
    %cst_12 = arith.constant 0.000000e+00 : f32
    %16 = vector.broadcast %cst_12 : f32 to vector<8x32xf32>
    %17 = arith.cmpf ogt, %15, %16 : vector<8x32xf32>
    %cst_13 = arith.constant 0.00999999977 : f32
    %18 = vector.broadcast %cst_13 : f32 to vector<8x32xf32>
    %19 = arith.mulf %18, %15 : vector<8x32xf32>
    %20 = arith.select %17, %15, %19 : vector<8x32xi1>, vector<8x32xf32>
    %c0_14 = arith.constant 0 : index
    %c0_15 = arith.constant 0 : index
    %21 = vector.load %arg6[%c0_14, %c0_15] : memref<32x32xf32, #tpu.memory_space<vmem>>, vector<32x32xf32>
    %cst_16 = arith.constant dense<0.000000e+00> : vector<8x32xf32>
    %22 = tpu.matmul %20, %21, %cst_16 {dimension_numbers = #tpu.dot_dimension_numbers<[1], [0], [0], [1], [0, 0, 1, 1], [], []>} : vector<8x32xf32>, vector<32x32xf32>, vector<8x32xf32> -> vector<8x32xf32>
    %c0_17 = arith.constant 0 : index
    %c0_18 = arith.constant 0 : index
    %23 = vector.load %arg7[%c0_17, %c0_18] : memref<1x32xf32, #tpu.memory_space<vmem>>, vector<1x32xf32>
    %24 = vector.broadcast %23 : vector<1x32xf32> to vector<8x32xf32>
    %25 = arith.addf %22, %24 : vector<8x32xf32>
    %26 = vector.extract_strided_slice %25 {offsets = [0, 0], sizes = [8, 16], strides = [1, 1]} : vector<8x32xf32> to vector<8x16xf32>
    %27 = vector.extract_strided_slice %25 {offsets = [0, 16], sizes = [8, 16], strides = [1, 1]} : vector<8x32xf32> to vector<8x16xf32>
    %28 = math.atan2 %26, %27 : vector<8x16xf32>
    %c0_19 = arith.constant 0 : index
    %c0_20 = arith.constant 0 : index
    %29 = vector.load %arg8[%c0_19, %c0_20] : memref<8x16xf32, #tpu.memory_space<vmem>>, vector<8x16xf32>
    tpu.vector_store %arg8[%c0_19, %c0_20], %28 {strides = array<i32>} : memref<8x16xf32, #tpu.memory_space<vmem>>, vector<8x16xf32>,
    return
  }
  func.func @transform_0(%arg0: i32) -> (i32, i32) {
    %c0_i32 = arith.constant 0 : i32
    %c0_i32_0 = arith.constant 0 : i32
    return %arg0, %c0_i32 : i32, i32
  }
  func.func @transform_1(%arg0: i32) -> (i32, i32) {
    %c0_i32 = arith.constant 0 : i32
    %c0_i32_0 = arith.constant 0 : i32
    %c0_i32_1 = arith.constant 0 : i32
    return %c0_i32, %c0_i32_0 : i32, i32
  }
  func.func @transform_2(%arg0: i32) -> (i32, i32) {
    %c0_i32 = arith.constant 0 : i32
    %c0_i32_0 = arith.constant 0 : i32
    %c0_i32_1 = arith.constant 0 : i32
    return %c0_i32, %c0_i32_0 : i32, i32
  }
  func.func @transform_3(%arg0: i32) -> (i32, i32) {
    %c0_i32 = arith.constant 0 : i32
    %c0_i32_0 = arith.constant 0 : i32
    %c0_i32_1 = arith.constant 0 : i32
    return %c0_i32, %c0_i32_0 : i32, i32
  }
  func.func @transform_4(%arg0: i32) -> (i32, i32) {
    %c0_i32 = arith.constant 0 : i32
    %c0_i32_0 = arith.constant 0 : i32
    %c0_i32_1 = arith.constant 0 : i32
    return %c0_i32, %c0_i32_0 : i32, i32
  }
  func.func @transform_5(%arg0: i32) -> (i32, i32) {
    %c0_i32 = arith.constant 0 : i32
    %c0_i32_0 = arith.constant 0 : i32
    %c0_i32_1 = arith.constant 0 : i32
    return %c0_i32, %c0_i32_0 : i32, i32
  }
  func.func @transform_6(%arg0: i32) -> (i32, i32) {
    %c0_i32 = arith.constant 0 : i32
    %c0_i32_0 = arith.constant 0 : i32
    %c0_i32_1 = arith.constant 0 : i32
    return %c0_i32, %c0_i32_0 : i32, i32
  }
  func.func @transform_7(%arg0: i32) -> (i32, i32) {
    %c0_i32 = arith.constant 0 : i32
    %c0_i32_0 = arith.constant 0 : i32
    return %arg0, %c0_i32 : i32, i32
  }
}

</mosaic_0001>

<bundles_post_ra>
// kernel: spn_half_forward.1
= control target key start
LH: loop header
LB: loop body
LE: loop exit
PB: predicated region body
PF: predicated region fallthrough
CT: control target
= control target key end

     0   :  { %12 = vsyncpa [#allocation3], 0  ;;  %s517_s0 = inlined_call_operand.hbm [shape: f32[8,32], index: 0, kind: input, shape index: {}]   ;;  %s518_s1 = inlined_call_operand.hbm [shape: f32[32,32], index: 1, kind: input, shape index: {}]   ;;  %s519_s2 = inlined_call_operand.vmem [shape: f32[1,32], index: 2, kind: input, shape index: {}]   ;;  %s520_s3 = inlined_call_operand.hbm [shape: f32[32,32], index: 3, kind: input, shape index: {}]   ;;  %s521_s4 = inlined_call_operand.vmem [shape: f32[1,32], index: 4, kind: input, shape index: {}]   ;;  %s522_s5 = inlined_call_operand.hbm [shape: f32[32,32], index: 5, kind: input, shape index: {}]   ;;  %s523_s6 = inlined_call_operand.vmem [shape: f32[1,32], index: 6, kind: input, shape index: {}]   ;;  %s524_s7 = inlined_call_operand.hbm [shape: f32[8,16], index: 7, kind: output, shape index: {}]  }
   0x1   :  { %13 = vsyncpa [#allocation6], 0 }
   0x2   :  { %14 = vsyncpa [#allocation9], 0  ;;  %s31_s26 = sshll.u32 %s518_s1, 4  ;;  %s32_s26 = int_to_ptr.hbm [resolvable:$true] %s31_s26 }
   0x3   :  { %15 = vsyncpa [#allocation4], 0  ;;  %s420_s27 = smov [#allocation5]   ;;  %s21_s8 = sshll.u32 %s517_s0, 4  ;;  %s22_s8 = int_to_ptr.hbm [resolvable:$true] %s21_s8 }
   0x4   :  { %s33_s28 = sshll.u32 %s420_s27, 4  ;;  %s421_s9 = smov 128   ;;  %s34_s28 = int_to_ptr.vmem [resolvable:$true] %s33_s28 }
   0x5   :  { %s422_s10 = smov 8   ;;  %s423_s11 = smov [#allocation2]  }
   0x6   :  { %39 = dma.hbm_to_vmem [thread:$0]  %s32_s26, 512, %s34_s28, [#allocation6], %s421_s9, %s421_s9, %s422_s10  }
   0x7   :  { %s23_s12 = sshll.u32 %s423_s11, 4  ;;  %s46_s15 = sshll.u32 %s520_s3, 4  ;;  %s24_s12 = int_to_ptr.vmem [resolvable:$true] %s23_s12  ;;  %s47_s15 = int_to_ptr.hbm [resolvable:$true] %s46_s15 }
   0x8   :  { %26 = dma.hbm_to_vmem [thread:$0]  %s22_s8, 128, %s24_s12, [#allocation3]  }
   0x9   :  { %s61_s17 = sshll.u32 %s522_s5, 4  ;;  %s424_s18 = smov [#allocation7]   ;;  %s62_s17 = int_to_ptr.hbm [resolvable:$true] %s61_s17 }
   0xa   :  { %s48_s19 = sshll.u32 %s424_s18, 4  ;;  %s425_s0 = smov [#allocation8]   ;;  %s49_s19 = int_to_ptr.vmem [resolvable:$true] %s48_s19 }
   0xb   :  { %54 = dma.hbm_to_vmem [thread:$0]  %s47_s15, 512, %s49_s19, [#allocation6], %s421_s9, %s421_s9, %s422_s10  }
   0xc   :  { %s63_s20 = sshll.u32 %s425_s0, 4  ;;  %s64_s20 = int_to_ptr.vmem [resolvable:$true] %s63_s20 }
   0xd   :  { %69 = dma.hbm_to_vmem [thread:$0]  %s62_s17, 512, %s64_s20, [#allocation9], %s421_s9, %s421_s9, %s422_s10  }
   0xe   :  { %412 = dma.done.wait [#allocation3], 128  }
   0xf   :  { %413 = vsyncadd [#allocation3], 4294967168 }
  0x10   :  { %414 = dma.done.wait [#allocation6], 1024  }
  0x11   :  { %415 = vsyncadd [#allocation6], 4294966272 }
  0x12   :  { %416 = dma.done.wait [#allocation9], 512  }
  0x13   :  { %417 = vsyncadd [#allocation9], 4294966784  ;;  %v92_v0 = vld [vmem:[#allocation5 + $0x18] sm:$0xff]  ;;  %v91_v1 = vld [vmem:[#allocation5 + $0x10] sm:$0xff]  ;;  %vm97_vm0 = vcmask 261120   ;;  %s426_s24 = smov 112  }
  0x14   :  { %113 = vmatpush.msra.mxu0 %v92_v0  ;;  %v127_v2 = vld [vmem:[#allocation7 + $0x18] sm:$0xff]  ;;  %v90_v3 = vld [vmem:[#allocation5 + $0x8] sm:$0xff]  ;;  %v89_v4 = vld [vmem:[#allocation5] sm:$0xff]  ;;  %s262_s27 = sshll.u32 %s524_s7, 4  ;;  %s263_s27 = int_to_ptr.hbm [resolvable:$true] %s262_s27 }
  0x15   :  { %147 = vmatpush.msra.mxu1 %v127_v2  ;;  %v88_v5 = vld [vmem:[#allocation2] sm:$0xff]  ;;  %v126_v6 = vld [vmem:[#allocation7 + $0x10] sm:$0xff]  ;;  %v125_v7 = vld [vmem:[#allocation7 + $0x8] sm:$0xff]  ;;  %v427_v2 = vmov 0.0  }
  0x16   :  { %114 = vmatpush.msra.mxu0 %v91_v1  ;;  %v124_v8 = vld [vmem:[#allocation7] sm:$0xff]  ;;  %v161_v9 = vld [vmem:[#allocation8 + $0x18] sm:$0xff]  ;;  %v160_v15 = vld [vmem:[#allocation8 + $0x10] sm:$0xff] }
  0x17   :  { %148 = vmatpush.msra.mxu1 %v126_v6  ;;  %181 = vmatpush.msra.mxu2 %v161_v9  ;;  %v287_v10 = vld [vmem:[%s519_s2] ss:$0 sm:$0xff]  ;;  %v159_v16 = vld [vmem:[#allocation8 + $0x8] sm:$0xff]  ;;  %v158_v17 = vld [vmem:[#allocation8] sm:$0xff]  ;;  %v428_v6 = vmov 0.7853982  }
  0x18   :  { %115 = vmatpush.msra.mxu0 %v90_v3  ;;  %v288_v18 = vld [vmem:[%s521_s4] ss:$0 sm:$0xff]  ;;  %s429_s4 = smov [#allocation10]  }
  0x19   :  { %149 = vmatpush.msra.mxu1 %v125_v7  ;;  %182 = vmatpush.msra.mxu2 %v160_v15  ;;  %v289_v23 = vld [vmem:[%s523_s6] ss:$0 sm:$0xff]  ;;  %s260_s6 = sshll.u32 %s429_s4, 4  ;;  %s261_s6 = int_to_ptr.vmem [resolvable:$true] %s260_s6 }
  0x1a   :  { %116 = vmatpush.msra.mxu0 %v89_v4 }
  0x1b   :  { %274 = vmatmul.msk.f32.vlgmr.msra.gmra.mxu0 %vm97_vm0, %v88_v5  ;;  %150 = vmatpush.msra.mxu1 %v124_v8 }
  0x1c   :  { %183 = vmatpush.msra.mxu2 %v159_v16 }
  0x1e   :  { %184 = vmatpush.msra.mxu2 %v158_v17 }
  0x98   :  { %v118_v11 = vpop.f32.mrf.mxu0 }
  0x99   :  { %v119_v12 = vadd.f32 %v287_v10, %v118_v11 }
  0x9b   :  { %v122_v13 = vmul.f32 0.01, %v119_v12  ;;  %vm121_vm1 = vcmp.gt.f32.partialorder %v119_v12, 0.0 }
  0x9d   :  { %v123_v14 = vsel %vm121_vm1, %v119_v12, %v122_v13  ;;  %vm253_vm1 = vcmask 130048  }
  0x9e   :  { %275 = vmatmul.msk.f32.vlgmr.msra.gmra.mxu1 %vm97_vm0, %v123_v14 }
 0x11b   :  { %v152_v19 = vpop.f32.mrf.mxu1 }
 0x11c   :  { %v153_v20 = vadd.f32 %v288_v18, %v152_v19 }
 0x11e   :  { %v156_v21 = vmul.f32 0.01, %v153_v20  ;;  %vm155_vm2 = vcmp.gt.f32.partialorder %v153_v20, 0.0 }
 0x120   :  { %v157_v22 = vsel %vm155_vm2, %v153_v20, %v156_v21 }
 0x121   :  { %276 = vmatmul.msk.f32.vlgmr.msra.gmra.mxu2 %vm97_vm0, %v157_v22 }
 0x1a4   :  { %v186_v24 = vpop.f32.mrf.mxu2 }
 0x1a5   :  { %v494_v25 = vadd.f32 %v289_v23, %v186_v24 }
 0x1a7   :  { %190 = vrot.lane.b32.xlu0 %v494_v25, %s426_s24  ;;  %v194_v26 = vand.u32 2147483647, %v494_v25  ;;  %vm241_vm4 = vcmp.ne.f32.partialorder %v494_v25, %v494_v25  ;;  %vm238_vm0 = vcmp.eq.f32.partialorder %v494_v25, 0.0  ;;  %v251_v10 = vand.u32 2147483648, %v494_v25 }
 0x1a9   :  { %vm247_vm7 = vcmp.eq.s32.totalorder %v194_v26, inf }
 0x219   :  { %v191_v27 = vpop.permute.xlu0 %190 }
 0x21a   :  { %v193_v28 = vand.u32 2147483647, %v191_v27  ;;  %vm240_vm3 = vcmp.ne.f32.partialorder %v191_v27, %v191_v27  ;;  %vm236_vm14 = vcmp.lt.s32.totalorder %v191_v27, 0  ;;  %vm233_vm15 = vcmp.lt.f32.partialorder %v191_v27, 0.0 }
 0x21b   :  { %vm500_vm5 = vmor %vm240_vm3, %vm241_vm4  ;;  %v237_v3 = vsel %vm236_vm14, 3.1415927, %v427_v2  ;;  %v245_v7 = vsel %vm233_vm15, 2.3561945, %v428_v6 }
 0x21c   :  { %v196_v30 = vmax.f32 %v193_v28, %v194_v26  ;;  %vm246_vm6 = vcmp.eq.s32.totalorder %v193_v28, inf  ;;  %v195_v40 = vmin.f32 %v193_v28, %v194_v26  ;;  %vm230_vm13 = vcmp.gt.f32.partialorder %v194_v26, %v193_v28 }
 0x21d   :  { %vm504_vm8 = vmand %vm246_vm6, %vm247_vm7 }
 0x21e   :  { %290 = vrcp.f32 %v196_v30  ;;  %v208_v35 = vand.u32 2147483648, %v196_v30  ;;  %v206_v37 = vand.u32 2147483647, %v196_v30  ;;  %vm202_vm10 = vweird.f32 %v196_v30 }
 0x220   :  { %v209_v39 = vor.u32 1.1754944e-38, %v208_v35  ;;  %vm207_vm12 = vcmp.eq.f32.partialorder %v206_v37, 8.507059e+37 }
 0x224   :  { %v291_v32 = vpop.eup %290 }
 0x225   :  { %v198_v33 = vmul.f32 %v291_v32, %v196_v30  ;;  %vm203_vm9 = vweird.f32 %v291_v32 }
 0x226   :  { %vm204_vm11 = vmor %vm202_vm10, %vm203_vm9 }
 0x227   :  { %v199_v34 = vsub.f32 1.0, %v198_v33 }
 0x229   :  { %v200_v36 = vmul.f32 %v291_v32, %v199_v34 }
 0x22b   :  { %v201_v38 = vadd.f32 %v291_v32, %v200_v36 }
 0x22d   :  { %v205_v41 = vsel %vm204_vm11, %v291_v32, %v201_v38 }
 0x22e   :  { %v210_v42 = vsel %vm207_vm12, %v209_v39, %v205_v41 }
 0x22f   :  { %v211_v43 = vmul.f32 %v210_v42, %v195_v40 }
 0x231   :  { %v212_v44 = vmul.f32 %v211_v43, %v211_v43 }
 0x233   :  { %v213_v45 = vmul.f32 0.002785687, %v212_v44 }
 0x235   :  { %v214_v46 = vadd.f32 -0.015866, %v213_v45 }
 0x237   :  { %v215_v47 = vmul.f32 %v214_v46, %v212_v44 }
 0x239   :  { %v216_v48 = vadd.f32 0.04247222, %v215_v47 }
 0x23b   :  { %v217_v49 = vmul.f32 %v216_v48, %v212_v44 }
 0x23d   :  { %v218_v50 = vadd.f32 -0.074975304, %v217_v49 }
 0x23f   :  { %v219_v51 = vmul.f32 %v218_v50, %v212_v44 }
 0x241   :  { %v220_v52 = vadd.f32 0.1064488, %v219_v51 }
 0x243   :  { %v221_v53 = vmul.f32 %v220_v52, %v212_v44 }
 0x245   :  { %v222_v54 = vadd.f32 -0.14207031, %v221_v53 }
 0x247   :  { %v223_v55 = vmul.f32 %v222_v54, %v212_v44 }
 0x249   :  { %v224_v56 = vadd.f32 0.19993454, %v223_v55 }
 0x24b   :  { %v225_v57 = vmul.f32 %v224_v56, %v212_v44 }
 0x24d   :  { %v226_v58 = vadd.f32 -0.33333147, %v225_v57 }
 0x24f   :  { %v227_v59 = vmul.f32 %v226_v58, %v212_v44 }
 0x251   :  { %v228_v60 = vmul.f32 %v227_v59, %v211_v43 }
 0x253   :  { %v229_v61 = vadd.f32 %v228_v60, %v211_v43 }
 0x255   :  { %v231_v62 = vsub.f32 1.5707964, %v229_v61 }
 0x257   :  { %v232_v63 = vsel %vm230_vm13, %v231_v62, %v229_v61 }
 0x258   :  { %v234_v0 = vsub.f32 3.1415927, %v232_v63 }
 0x25a   :  { %v235_v1 = vsel %vm233_vm15, %v234_v0, %v232_v63 }
 0x25b   :  { %v239_v4 = vsel %vm238_vm0, %v237_v3, %v235_v1 }
 0x25c   :  { %v243_v5 = vsel %vm500_vm5, nan, %v239_v4 }
 0x25d   :  { %v249_v8 = vsel %vm504_vm8, %v245_v7, %v243_v5 }
 0x25e   :  { %v250_v9 = vand.u32 2147483647, %v249_v8 }
 0x260   :  { %v252_v11 = vor.u32 %v251_v10, %v250_v9 }
 0x262   :  { %254 = vst.msk [vmem:[#allocation10] sm:$0xff] %vm253_vm1, %v252_v11 }
 0x263   :  { %265 = dma.vmem_to_hbm [thread:$0]  %s261_s6, 128, %s263_s27, [#allocation4]  }
 0x264   :  { %418 = dma.done.wait [#allocation4], 128  }
 0x265   :  { %419 = vsyncadd [#allocation4], 4294967168 }
 0x266   :  { %270 = vsyncpa [#allocation3], 1 }
 0x267   :  { %271 = vsyncpa [#allocation6], 1 }
 0x268   :  { %272 = vsyncpa [#allocation9], 1 }
 0x269   :  { %273 = vsyncpa [#allocation4], 1 }

</bundles_post_ra>
